<compile_context>
chip_gen: v6e
topology: v6e:2x2x1
jax: 0.10.0
libtpu: 0.0.40
codegen_flags: <defaults>
</compile_context>

<pallas_src>
import functools

import jax
import jax.numpy as jnp
from jax.experimental import pallas as pl
from jax.experimental.pallas import tpu as pltpu


def _squeeze_block_kernel(x_ref, w1_ref, b1_ref, w2_ref, b2_ref, o_ref, *, inv_hw):
    # x_ref/o_ref: (bt, C, HW)   w1: (C, Cr)  b1: (1, Cr)  w2: (Cr, C)  b2: (1, C)

    # Global average pool over spatial lanes; accumulate the reduction in f32.
    # Mosaic masks the lane tail when HW is not a multiple of 128, so the sum
    # only covers the logical HW elements.
    s = jnp.sum(x_ref[...], axis=-1, dtype=jnp.float32) * inv_hw          # (bt, C)

    # SE MLP: Linear -> ReLU -> Linear -> h_sigmoid (batched over bt rows).
    h = jnp.dot(s, w1_ref[...], preferred_element_type=jnp.float32) + b1_ref[...]
    h = jnp.maximum(h, 0.0)                                                # (bt, Cr)
    y = jnp.dot(h, w2_ref[...], preferred_element_type=jnp.float32) + b2_ref[...]
    gate = jnp.clip(y + 3.0, 0.0, 6.0) * (1.0 / 6.0)                       # (bt, C)

    # Re-read x from VMEM (free; data already resident) so the big block is not
    # a single live value with two consumers; multiply in x's dtype so a bf16
    # input never materializes an f32 copy of the block.
    o_ref[...] = (x_ref[...] * gate[:, :, None].astype(x_ref.dtype)).astype(o_ref.dtype)


def _round_up(x, m):
    return ((x + m - 1) // m) * m


def _choose_batch_tile(B, plane_vmem_bytes, target_bytes=8 << 20, min_block_bytes=1 << 20):
    """Batch tile giving ~target_bytes blocks, but >=2 steps per TC when B allows."""
    plane_vmem_bytes = max(plane_vmem_bytes, 1)
    bt = max(1, min(B, target_bytes // plane_vmem_bytes))
    # Prefer >=4 grid steps (>=2 per v7x TensorCore) so the auto-pipeline can
    # hide input DMA / output writeback, as long as blocks stay >= ~1 MB.
    min_steps = min(B, 4)
    if min_steps > 1:
        bt_for_steps = pl.cdiv(B, min_steps)
        bt_floor = max(1, min_block_bytes // plane_vmem_bytes)
        bt = min(bt, max(bt_for_steps, bt_floor))
    return max(min(bt, B), 1)


def squeeze_block(x, w1, b1, w2, b2, *, batch_tile=None):
    """x: (B, C, H, W).  w1: (C, Cr), b1: (Cr,), w2: (Cr, C), b2: (C,) (pre-transposed Linear weights)."""
    B, C, H, W = x.shape
    Cr = w1.shape[1]
    HW = H * W
    itemsize = jnp.dtype(x.dtype).itemsize

    # No pad / slice passes: blocks span the full (C, HW) extents.
    x_flat = x.reshape(B, C, HW)

    # VMEM footprint of one (1, C, HW) plane uses the hardware-padded tile dims.
    sublane = max(8, 32 // itemsize)                     # 8 for f32, 16 for bf16
    plane_vmem = _round_up(C, sublane) * _round_up(HW, 128) * itemsize

    bt = batch_tile if batch_tile is not None else _choose_batch_tile(B, plane_vmem)
    grid = (pl.cdiv(B, bt),)                             # partial last block OK

    block_vmem = bt * plane_vmem
    w_vmem = (_round_up(C, 8) * _round_up(Cr, 128)
              + 8 * _round_up(Cr, 128)
              + _round_up(Cr, 8) * _round_up(C, 128)
              + 8 * _round_up(C, 128)) * 4
    # Double-buffered in + out blocks, double-buffered params, compiler scratch.
    vmem_need = 4 * block_vmem + 2 * w_vmem + (4 << 20)

    try:
        vmem_capacity = int(pltpu.get_tpu_info().vmem_capacity_bytes)
    except Exception:
        vmem_capacity = 64 << 20                         # conservative (v7x)
    vmem_cap = max(min(int(0.8 * vmem_capacity), vmem_capacity - (16 << 20)), 32 << 20)
    vmem_limit = int(min(max(vmem_need, 4 << 20), vmem_cap))

    cost = pl.CostEstimate(
        flops=int(3 * B * C * HW + 4 * B * C * Cr),
        transcendentals=0,
        bytes_accessed=int(2 * B * C * HW * itemsize + w_vmem),
    )

    w1f = w1.astype(jnp.float32)
    w2f = w2.astype(jnp.float32)
    b1_2d = b1.reshape(1, Cr).astype(jnp.float32)
    b2_2d = b2.reshape(1, C).astype(jnp.float32)

    kernel = functools.partial(_squeeze_block_kernel, inv_hw=1.0 / HW)

    out_flat = pl.pallas_call(
        kernel,
        out_shape=jax.ShapeDtypeStruct((B, C, HW), x.dtype),
        grid_spec=pltpu.PrefetchScalarGridSpec(
            num_scalar_prefetch=0,
            grid=grid,
            in_specs=[
                pl.BlockSpec((bt, C, HW), lambda i: (i, 0, 0)),
                pl.BlockSpec((C, Cr), lambda i: (0, 0)),   # resident across steps
                pl.BlockSpec((1, Cr), lambda i: (0, 0)),
                pl.BlockSpec((Cr, C), lambda i: (0, 0)),
                pl.BlockSpec((1, C), lambda i: (0, 0)),
            ],
            out_specs=pl.BlockSpec((bt, C, HW), lambda i: (i, 0, 0)),
        ),
        compiler_params=pltpu.CompilerParams(
            dimension_semantics=("parallel",),
            vmem_limit_bytes=vmem_limit,
        ),
        cost_estimate=cost,
    )(x_flat, w1f, b1_2d, w2f, b2_2d)

    return out_flat.reshape(B, C, H, W)


def squeeze_block_reference(x, w1, b1, w2, b2):
    """Plain-JAX reference mirroring the PyTorch forward."""
    s = jnp.mean(x, axis=(2, 3))                      # avg_pool2d(kernel=[H,W]) + view
    h = jnp.maximum(s @ w1 + b1, 0.0)                 # Linear + ReLU
    y = h @ w2 + b2                                   # Linear
    gate = jnp.clip(y + 3.0, 0.0, 6.0) / 6.0          # h_sigmoid
    return gate[:, :, None, None] * x


def _run_case(key, B, C, H, W, divide=4, batch_tile=None):
    Cr = C // divide
    kx, k1, kb1, k2, kb2 = jax.random.split(key, 5)
    x = jax.random.normal(kx, (B, C, H, W), dtype=jnp.float32)
    # nn.Linear(C, Cr): weight (Cr, C), bias (Cr,) -> pre-transposed to (C, Cr).
    w1 = jax.random.normal(k1, (C, Cr), dtype=jnp.float32) * 0.1
    b1 = jax.random.normal(kb1, (Cr,), dtype=jnp.float32) * 0.1
    # nn.Linear(Cr, C): weight (C, Cr), bias (C,) -> pre-transposed to (Cr, C).
    w2 = jax.random.normal(k2, (Cr, C), dtype=jnp.float32) * 0.1
    b2 = jax.random.normal(kb2, (C,), dtype=jnp.float32) * 0.1

    out = jax.block_until_ready(squeeze_block(x, w1, b1, w2, b2, batch_tile=batch_tile))
    ref = squeeze_block_reference(x, w1, b1, w2, b2)
    assert out.shape == (B, C, H, W)
    assert jnp.allclose(out, ref, atol=1e-5, rtol=1e-5)


if __name__ == "__main__":
    key = jax.random.PRNGKey(0)
    k1, k2, k3 = jax.random.split(key, 3)

    # Lane-aligned spatial (HW = 256).
    _run_case(k1, B=2, C=32, H=16, W=16, divide=4)
    # Non-aligned spatial (HW = 49): exercises the in-kernel masked lane tail
    # (no host-side pad/slice anymore).
    _run_case(k2, B=2, C=16, H=7, W=7, divide=4)
    # Odd batch with a forced batch tile: exercises the cdiv grid with a
    # partial last batch block.
    _run_case(k3, B=5, C=32, H=7, W=7, divide=4, batch_tile=2)

    print("KERNEL_OK")
</pallas_src>

<mosaic_0001>
module attributes {stable_mosaic.version = 11 : i64} {
  func.func @_squeeze_block_kernel(%arg0: i32, %arg1: memref<2x32x256xf32, #tpu.memory_space<vmem>>, %arg2: memref<32x8xf32, #tpu.memory_space<vmem>>, %arg3: memref<1x8xf32, #tpu.memory_space<vmem>>, %arg4: memref<8x32xf32, #tpu.memory_space<vmem>>, %arg5: memref<1x32xf32, #tpu.memory_space<vmem>>, %arg6: memref<2x32x256xf32, #tpu.memory_space<vmem>>) attributes {dimension_semantics = [#tpu.dimension_semantics<parallel>], iteration_bounds = array<i64: 1>, scalar_prefetch = 0 : i64, scratch_operands = 0 : i64, tpu.core_type = #tpu.core_type<tc>, window_params = [{transform_indices = @transform_0, window_bounds = array<i64: 2, 32, 256>}, {pipeline_mode = #tpu.pipeline_mode<synchronous>, transform_indices = @transform_1, window_bounds = array<i64: 32, 8>}, {pipeline_mode = #tpu.pipeline_mode<synchronous>, transform_indices = @transform_2, window_bounds = array<i64: 1, 8>}, {pipeline_mode = #tpu.pipeline_mode<synchronous>, transform_indices = @transform_3, window_bounds = array<i64: 8, 32>}, {pipeline_mode = #tpu.pipeline_mode<synchronous>, transform_indices = @transform_4, window_bounds = array<i64: 1, 32>}, {transform_indices = @transform_5, window_bounds = array<i64: 2, 32, 256>}]} {
    %c0 = arith.constant 0 : index
    %c0_0 = arith.constant 0 : index
    %c0_1 = arith.constant 0 : index
    %0 = vector.load %arg1[%c0, %c0_0, %c0_1] : memref<2x32x256xf32, #tpu.memory_space<vmem>>, vector<2x32x256xf32>
    %cst = arith.constant dense<0.000000e+00> : vector<2x32xf32>
    %1 = vector.multi_reduction <add>, %0, %cst [2] : vector<2x32x256xf32> to vector<2x32xf32>
    %cst_2 = arith.constant 3.906250e-03 : f32
    %2 = vector.broadcast %cst_2 : f32 to vector<2x32xf32>
    %3 = arith.mulf %1, %2 : vector<2x32xf32>
    %c0_3 = arith.constant 0 : index
    %c0_4 = arith.constant 0 : index
    %4 = vector.load %arg2[%c0_3, %c0_4] : memref<32x8xf32, #tpu.memory_space<vmem>>, vector<32x8xf32>
    %cst_5 = arith.constant dense<0.000000e+00> : vector<2x8xf32>
    %5 = tpu.matmul %3, %4, %cst_5 {dimension_numbers = #tpu.dot_dimension_numbers<[1], [0], [0], [1], [0, 0, 1, 1], [], []>} : vector<2x32xf32>, vector<32x8xf32>, vector<2x8xf32> -> vector<2x8xf32>
    %c0_6 = arith.constant 0 : index
    %c0_7 = arith.constant 0 : index
    %6 = vector.load %arg3[%c0_6, %c0_7] : memref<1x8xf32, #tpu.memory_space<vmem>>, vector<1x8xf32>
    %7 = vector.broadcast %6 : vector<1x8xf32> to vector<2x8xf32>
    %8 = arith.addf %5, %7 : vector<2x8xf32>
    %cst_8 = arith.constant 0.000000e+00 : f32
    %9 = vector.broadcast %cst_8 : f32 to vector<2x8xf32>
    %10 = arith.maximumf %8, %9 : vector<2x8xf32>
    %c0_9 = arith.constant 0 : index
    %c0_10 = arith.constant 0 : index
    %11 = vector.load %arg4[%c0_9, %c0_10] : memref<8x32xf32, #tpu.memory_space<vmem>>, vector<8x32xf32>
    %cst_11 = arith.constant dense<0.000000e+00> : vector<2x32xf32>
    %12 = tpu.matmul %10, %11, %cst_11 {dimension_numbers = #tpu.dot_dimension_numbers<[1], [0], [0], [1], [0, 0, 1, 1], [], []>} : vector<2x8xf32>, vector<8x32xf32>, vector<2x32xf32> -> vector<2x32xf32>
    %c0_12 = arith.constant 0 : index
    %c0_13 = arith.constant 0 : index
    %13 = vector.load %arg5[%c0_12, %c0_13] : memref<1x32xf32, #tpu.memory_space<vmem>>, vector<1x32xf32>
    %14 = vector.broadcast %13 : vector<1x32xf32> to vector<2x32xf32>
    %15 = arith.addf %12, %14 : vector<2x32xf32>
    %cst_14 = arith.constant 3.000000e+00 : f32
    %16 = vector.broadcast %cst_14 : f32 to vector<2x32xf32>
    %17 = arith.addf %15, %16 : vector<2x32xf32>
    %cst_15 = arith.constant 0.000000e+00 : f32
    %cst_16 = arith.constant 6.000000e+00 : f32
    %18 = vector.broadcast %cst_15 : f32 to vector<2x32xf32>
    %19 = arith.maximumf %18, %17 : vector<2x32xf32>
    %20 = vector.broadcast %cst_16 : f32 to vector<2x32xf32>
    %21 = arith.minimumf %20, %19 : vector<2x32xf32>
    %cst_17 = arith.constant 0.166666672 : f32
    %22 = vector.broadcast %cst_17 : f32 to vector<2x32xf32>
    %23 = arith.mulf %21, %22 : vector<2x32xf32>
    %c0_18 = arith.constant 0 : index
    %c0_19 = arith.constant 0 : index
    %c0_20 = arith.constant 0 : index
    %24 = vector.load %arg1[%c0_18, %c0_19, %c0_20] : memref<2x32x256xf32, #tpu.memory_space<vmem>>, vector<2x32x256xf32>
    %25 = vector.shape_cast %23 : vector<2x32xf32> to vector<2x32x1xf32>
    %26 = vector.broadcast %25 : vector<2x32x1xf32> to vector<2x32x256xf32>
    %27 = arith.mulf %24, %26 : vector<2x32x256xf32>
    %c0_21 = arith.constant 0 : index
    %c0_22 = arith.constant 0 : index
    %c0_23 = arith.constant 0 : index
    %28 = vector.load %arg6[%c0_21, %c0_22, %c0_23] : memref<2x32x256xf32, #tpu.memory_space<vmem>>, vector<2x32x256xf32>
    tpu.vector_store %arg6[%c0_21, %c0_22, %c0_23], %27 {strides = array<i32>} : memref<2x32x256xf32, #tpu.memory_space<vmem>>, vector<2x32x256xf32>,
    return
  }
  func.func @transform_0(%arg0: i32) -> (i32, i32, i32) {
    %c0_i32 = arith.constant 0 : i32
    %c0_i32_0 = arith.constant 0 : i32
    %c0_i32_1 = arith.constant 0 : i32
    return %arg0, %c0_i32, %c0_i32_0 : i32, i32, i32
  }
  func.func @transform_1(%arg0: i32) -> (i32, i32) {
    %c0_i32 = arith.constant 0 : i32
    %c0_i32_0 = arith.constant 0 : i32
    %c0_i32_1 = arith.constant 0 : i32
    return %c0_i32, %c0_i32_0 : i32, i32
  }
  func.func @transform_2(%arg0: i32) -> (i32, i32) {
    %c0_i32 = arith.constant 0 : i32
    %c0_i32_0 = arith.constant 0 : i32
    %c0_i32_1 = arith.constant 0 : i32
    return %c0_i32, %c0_i32_0 : i32, i32
  }
  func.func @transform_3(%arg0: i32) -> (i32, i32) {
    %c0_i32 = arith.constant 0 : i32
    %c0_i32_0 = arith.constant 0 : i32
    %c0_i32_1 = arith.constant 0 : i32
    return %c0_i32, %c0_i32_0 : i32, i32
  }
  func.func @transform_4(%arg0: i32) -> (i32, i32) {
    %c0_i32 = arith.constant 0 : i32
    %c0_i32_0 = arith.constant 0 : i32
    %c0_i32_1 = arith.constant 0 : i32
    return %c0_i32, %c0_i32_0 : i32, i32
  }
  func.func @transform_5(%arg0: i32) -> (i32, i32, i32) {
    %c0_i32 = arith.constant 0 : i32
    %c0_i32_0 = arith.constant 0 : i32
    %c0_i32_1 = arith.constant 0 : i32
    return %arg0, %c0_i32, %c0_i32_0 : i32, i32, i32
  }
}

</mosaic_0001>

<bundles_post_ra>
// kernel: tpu_custom_call.1
= control target key start
LH: loop header
LB: loop body
LE: loop exit
PB: predicated region body
PF: predicated region fallthrough
CT: control target
= control target key end

     0   :  { %10 = vsyncpa [#allocation3], 0  ;;  %s615_s0 = inlined_call_operand.hbm [shape: f32[2,32,256], index: 0, kind: input, shape index: {}]   ;;  %s616_s1 = inlined_call_operand.vmem [shape: f32[32,8], index: 1, kind: input, shape index: {}]   ;;  %s617_s2 = inlined_call_operand.vmem [shape: f32[1,8], index: 2, kind: input, shape index: {}]   ;;  %s618_s3 = inlined_call_operand.vmem [shape: f32[8,32], index: 3, kind: input, shape index: {}]   ;;  %s619_s4 = inlined_call_operand.vmem [shape: f32[1,32], index: 4, kind: input, shape index: {}]   ;;  %s620_s5 = inlined_call_operand.hbm [shape: f32[2,32,256], index: 5, kind: output, shape index: {}]  }
   0x1   :  { %11 = vsyncpa [#allocation4], 0  ;;  %s474_s18 = smov [#allocation2]  }
   0x2   :  { %s17_s19 = sshll.u32 %s474_s18, 4  ;;  %s18_s19 = int_to_ptr.vmem [resolvable:$true] %s17_s19 }
   0x3   :  { %s438_s20 = scalar_lea.vmem %s18_s19, 2048  ;;  %p443_p1 = scmp.lt.s32.totalorder %s18_s19, %s18_s19 }
   0x4   :  { %p439_p0 = scmp.ne.s32.totalorder %s18_s19, %s438_s20  ;;  %p444_p2 = scmp.lt.s32.totalorder %s438_s20, %s438_s20 }
   0x6   :  { %p445_p3 = por %p444_p2, %p443_p1 }
   0x8   :  { %p446_p4 = pnand %p445_p3, %p439_p0 }
   0xa   :  { %449 = shalt.err (!%p446_p4)
}
   0xb   :  { %s475_s21 = smov 256   ;;  %s476_s22 = smov 16  }
   0xc   :  { %23 = dma.hbm_to_vmem [thread:$0]  %s615_s0, 2048, %s18_s19, [#allocation3], %s475_s21, %s475_s21, %s476_s22  }
   0xd   :  { %470 = dma.done.wait [#allocation3], 2048  }
   0xe   :  { %471 = vsyncadd [#allocation3], 4294965248  ;;  %v516_v0 = vld [vmem:[#allocation2 + $0x40] sm:$0xff]  ;;  %v518_v1 = vld [vmem:[#allocation2 + $0x48] sm:$0xff]  ;;  %v477_v24 = vmov 0.0   ;;  %vm478_vm0 = vmmov 0   ;;  %v102_v29 = vlaneseq }
   0xf   :  { %v520_v2 = vld [vmem:[#allocation2] sm:$0xff]  ;;  %v63_v3 = vadd.f32 %v518_v1, %v516_v0  ;;  %v524_v4 = vld [vmem:[#allocation2 + $0x8] sm:$0xff]  ;;  %v526_v5 = vld [vmem:[#allocation2 + $0x50] sm:$0xff]  ;;  %408 = vmatprep.subr.mxu0 %v477_v24  ;;  %419 = vmatprep.subr.mxu1 %v477_v24  ;;  %vm113_vm1 = vcmask 130112   ;;  %vm120_vm2 = vcmask 195712   ;;  %vm127_vm3 = vcmask 261312  }
  0x10   :  { %v528_v6 = vld [vmem:[#allocation2 + $0x58] sm:$0xff]  ;;  %v51_v7 = vadd.f32 %v524_v4, %v520_v2  ;;  %v532_v8 = vld [vmem:[#allocation2 + $0x10] sm:$0xff]  ;;  %v540_v12 = vld [vmem:[#allocation2 + $0x60] sm:$0xff]  ;;  %416 = vmatprep.mubr.msk.f32.mxu0 %vm478_vm0, %v477_v24  ;;  %421 = vmatprep.mubr.msk.f32.mxu1 %vm478_vm0, %v477_v24  ;;  %v103_v31 = vand.u32 127, %v102_v29  ;;  %v576_v36 = vshrl.u32 %v102_v29, 7  ;;  %vm148_vm4 = vcmask 1041409  }
  0x11   :  { %v534_v9 = vld [vmem:[#allocation2 + $0x18] sm:$0xff]  ;;  %64 = vadd.xlane.f32.xlu1 %v63_v3  ;;  %v66_v10 = vadd.f32 %v528_v6, %v526_v5  ;;  %v542_v13 = vld [vmem:[#allocation2 + $0x68] sm:$0xff]  ;;  %v544_v14 = vld [vmem:[#allocation2 + $0x20] sm:$0xff]  ;;  %vm150_vm5 = vcmask 261120   ;;  %vm232_vm6 = vcmask 64512  }
  0x12   :  { %52 = vadd.xlane.f32.xlu0 %v51_v7  ;;  %v54_v11 = vadd.f32 %v534_v9, %v532_v8  ;;  %v546_v15 = vld [vmem:[#allocation2 + $0x28] sm:$0xff]  ;;  %v69_v16 = vadd.f32 %v542_v13, %v540_v12  ;;  %v552_v18 = vld [vmem:[#allocation2 + $0x70] sm:$0xff]  ;;  %v554_v19 = vld [vmem:[#allocation2 + $0x78] sm:$0xff]  ;;  %v108_v33 = vadd.s32 4294967288, %v103_v31  ;;  %v115_v35 = vadd.s32 4294967280, %v103_v31 }
  0x13   :  { %v57_v17 = vadd.f32 %v546_v15, %v544_v14  ;;  %v556_v20 = vld [vmem:[#allocation2 + $0x30] sm:$0xff]  ;;  %v558_v21 = vld [vmem:[#allocation2 + $0x38] sm:$0xff]  ;;  %v72_v22 = vadd.f32 %v554_v19, %v552_v18  ;;  %v84_v27 = vld [vmem:[%s616_s1 + $0x8] sm:$0xff]  ;;  %v122_v40 = vadd.s32 4294967272, %v103_v31  ;;  %v106_v44 = vsub.s32 %v103_v31, %v576_v36 }
  0x14   :  { %v60_v23 = vadd.f32 %v558_v21, %v556_v20  ;;  %v86_v25 = vld [vmem:[%s616_s1 + $0x18] sm:$0xff]  ;;  %v85_v26 = vld [vmem:[%s616_s1 + $0x10] sm:$0xff]  ;;  %v83_v28 = vld [vmem:[%s616_s1] sm:$0xff]  ;;  %v111_v38 = vsub.s32 %v108_v33, %v576_v36  ;;  %v118_v42 = vsub.s32 %v115_v35, %v576_v36  ;;  %v312_v35 = vsub.s32 0, %v576_v36 }
  0x15   :  { %67 = vadd.xlane.f32.xlu1 %v66_v10  ;;  %409 = vmatpush3.msra.mxu0 %v86_v25  ;;  %v125_v51 = vsub.s32 %v122_v40, %v576_v36 }
  0x16   :  { %55 = vadd.xlane.f32.xlu0 %v54_v11  ;;  %410 = vmatprep.subr.mxu0 %v477_v24 }
  0x17   :  { %411 = vmatpush3.msra.mxu0 %v85_v26 }
  0x18   :  { %412 = vmatprep.subr.mxu0 %v477_v24 }
  0x19   :  { %70 = vadd.xlane.f32.xlu1 %v69_v16  ;;  %413 = vmatpush3.msra.mxu0 %v84_v27 }
  0x1a   :  { %58 = vadd.xlane.f32.xlu0 %v57_v17  ;;  %414 = vmatprep.subr.mxu0 %v477_v24 }
  0x1b   :  { %415 = vmatpush3.msra.mxu0 %v83_v28  ;;  %v399_v28 = vld [vmem:[%s619_s4] ss:$0 sm:$0xff] }
  0x1d   :  { %73 = vadd.xlane.f32.xlu1 %v72_v22  ;;  %v224_v22 = vld [vmem:[%s618_s3] sm:$0xff] }
  0x1e   :  { %61 = vadd.xlane.f32.xlu0 %v60_v23  ;;  %420 = vmatpush3.msra.mxu1 %v224_v22  ;;  %v397_v23 = vld [vmem:[%s617_s2] ss:$0 sm:$0xff]  ;;  %s479_s2 = smov [#allocation5]  }
  0x1f   :  { %s385_s3 = sshll.u32 %s479_s2, 4  ;;  %s386_s3 = int_to_ptr.vmem [resolvable:$true] %s385_s3 }
  0x20   :  { %s450_s4 = scalar_lea.vmem %s386_s3, 2048  ;;  %p455_p6 = scmp.lt.s32.totalorder %s386_s3, %s386_s3 }
  0x21   :  { %p451_p5 = scmp.ne.s32.totalorder %s386_s3, %s450_s4  ;;  %p456_p7 = scmp.lt.s32.totalorder %s450_s4, %s450_s4 }
  0x23   :  { %p457_p8 = por %p456_p7, %p455_p6 }
  0x25   :  { %p458_p9 = pnand %p457_p8, %p451_p5 }
  0x9a   :  { %v65_v30 = vpop.xlane.xlu1 %64 }
  0x9b   :  { %v53_v32 = vpop.xlane.xlu0 %52  ;;  %v79_v45 = vmul.f32 0.00390625, %v65_v30 }
  0x9c   :  { %v75_v48 = vmul.f32 0.00390625, %v53_v32 }
  0x9d   :  { %v132_v55 = vrot.slane %v79_v45, %v106_v44 }
  0x9e   :  { %v68_v34 = vpop.xlane.xlu1 %67  ;;  %v107_v59 = vrot.slane %v75_v48, %v106_v44 }
  0x9f   :  { %v56_v37 = vpop.xlane.xlu0 %55  ;;  %v80_v39 = vmul.f32 0.00390625, %v68_v34 }
  0xa0   :  { %v76_v41 = vmul.f32 0.00390625, %v56_v37 }
  0xa1   :  { %v136_v50 = vrot.slane %v80_v39, %v111_v38  ;;  %v331_v39 = vsub.s32 1, %v576_v36 }
  0xa2   :  { %v71_v43 = vpop.xlane.xlu1 %70  ;;  %v112_v52 = vrot.slane %v76_v41, %v111_v38 }
  0xa3   :  { %v81_v46 = vmul.f32 0.00390625, %v71_v43  ;;  %v59_v47 = vpop.xlane.xlu0 %58  ;;  %v137_v61 = vsel %vm113_vm1, %v136_v50, %v132_v55 }
  0xa4   :  { %v77_v49 = vmul.f32 0.00390625, %v59_v47  ;;  %v114_v63 = vsel %vm113_vm1, %v112_v52, %v107_v59 }
  0xa5   :  { %v141_v53 = vrot.slane %v81_v46, %v118_v42 }
  0xa6   :  { %v74_v54 = vpop.xlane.xlu1 %73  ;;  %v119_v56 = vrot.slane %v77_v49, %v118_v42 }
  0xa7   :  { %v82_v57 = vmul.f32 0.00390625, %v74_v54  ;;  %v62_v58 = vpop.xlane.xlu0 %61  ;;  %v142_v3 = vsel %vm120_vm2, %v141_v53, %v137_v61 }
  0xa8   :  { %v78_v60 = vmul.f32 0.00390625, %v62_v58  ;;  %v121_v10 = vsel %vm120_vm2, %v119_v56, %v114_v63 }
  0xa9   :  { %v146_v62 = vrot.slane %v82_v57, %v125_v51 }
  0xaa   :  { %v126_v7 = vrot.slane %v78_v60, %v125_v51 }
  0xab   :  { %v147_v11 = vsel %vm127_vm3, %v146_v62, %v142_v3 }
  0xac   :  { %v128_v16 = vsel %vm127_vm3, %v126_v7, %v121_v10 }
  0xad   :  { %v149_v17 = vsel %vm148_vm4, %v147_v11, %v128_v16 }
  0xae   :  { %417 = vmatmul.mubr.msk.f32.vlgmr.msra.gmra.mxu0 %vm150_vm5, %v149_v17 }
 0x16e   :  { %v219_v24 = vpop.f32.mrf.mxu0 }
 0x16f   :  { %v220_v25 = vadd.f32 %v397_v23, %v219_v24 }
 0x170   :  { %v418_v26 = vpop.f32.mrf.mxu0 }
 0x171   :  { %v223_v27 = vmax.f32 %v220_v25, 0.0 }
 0x173   :  { %422 = vmatmul.mubr.msk.f32.vlgmr.msra.gmra.mxu1 %vm232_vm6, %v223_v27 }
 0x233   :  { %v302_v29 = vpop.f32.mrf.mxu1 }
 0x234   :  { %v303_v30 = vadd.f32 %v399_v28, %v302_v29 }
 0x235   :  { %v423_v31 = vpop.f32.mrf.mxu1 }
 0x236   :  { %v306_v32 = vadd.f32 3.0, %v303_v30 }
 0x238   :  { %v307_v33 = vmax.f32 %v306_v32, 0.0 }
 0x23a   :  { %v308_v34 = vmin.f32 %v307_v33, 6.0 }
 0x23c   :  { %v309_v37 = vmul.f32 0.16666667, %v308_v34 }
 0x23e   :  { %v313_v38 = vrot.slane %v309_v37, %v312_v35  ;;  %v332_v40 = vrot.slane %v309_v37, %v331_v39 }
 0x240   :  { %319 = vbcast.lane.b32.xlu1 %v313_v38, 264  ;;  %315 = vbcast.lane.b32.xlu0 %v313_v38, 256 }
 0x244   :  { %323 = vbcast.lane.b32.xlu1 %v313_v38, 272  ;;  %334 = vbcast.lane.b32.xlu0 %v332_v40, 256 }
 0x248   :  { %327 = vbcast.lane.b32.xlu1 %v313_v38, 280  ;;  %342 = vbcast.lane.b32.xlu0 %v332_v40, 272 }
 0x24c   :  { %338 = vbcast.lane.b32.xlu1 %v332_v40, 264 }
 0x250   :  { %346 = vbcast.lane.b32.xlu1 %v332_v40, 280 }
 0x2b2   :  { %v320_v41 = vpop.permute.xlu1 %319  ;;  %v316_v42 = vpop.permute.xlu0 %315 }
 0x2b3   :  { %v350_v43 = vmul.f32 %v320_v41, %v532_v8  ;;  %v351_v44 = vmul.f32 %v320_v41, %v534_v9  ;;  %v348_v45 = vmul.f32 %v316_v42, %v520_v2  ;;  %v349_v46 = vmul.f32 %v316_v42, %v524_v4 }
 0x2b5   :  { %366 = vst [vmem:[#allocation5 + $0x10] sm:$0xff] %v350_v43  ;;  %367 = vst [vmem:[#allocation5 + $0x18] sm:$0xff] %v351_v44 }
 0x2b6   :  { %364 = vst [vmem:[#allocation5] sm:$0xff] %v348_v45  ;;  %365 = vst [vmem:[#allocation5 + $0x8] sm:$0xff] %v349_v46  ;;  %v324_v36 = vpop.permute.xlu1 %323  ;;  %v335_v47 = vpop.permute.xlu0 %334 }
 0x2b7   :  { %v352_v48 = vmul.f32 %v324_v36, %v544_v14  ;;  %v353_v49 = vmul.f32 %v324_v36, %v546_v15  ;;  %v356_v50 = vmul.f32 %v335_v47, %v516_v0  ;;  %v357_v8 = vmul.f32 %v335_v47, %v518_v1 }
 0x2b9   :  { %368 = vst [vmem:[#allocation5 + $0x20] sm:$0xff] %v352_v48  ;;  %369 = vst [vmem:[#allocation5 + $0x28] sm:$0xff] %v353_v49 }
 0x2ba   :  { %372 = vst [vmem:[#allocation5 + $0x40] sm:$0xff] %v356_v50  ;;  %373 = vst [vmem:[#allocation5 + $0x48] sm:$0xff] %v357_v8  ;;  %v328_v2 = vpop.permute.xlu1 %327  ;;  %v343_v4 = vpop.permute.xlu0 %342 }
 0x2bb   :  { %v354_v9 = vmul.f32 %v328_v2, %v556_v20  ;;  %v355_v51 = vmul.f32 %v328_v2, %v558_v21  ;;  %v360_v52 = vmul.f32 %v343_v4, %v540_v12  ;;  %v361_v14 = vmul.f32 %v343_v4, %v542_v13 }
 0x2bd   :  { %370 = vst [vmem:[#allocation5 + $0x30] sm:$0xff] %v354_v9  ;;  %371 = vst [vmem:[#allocation5 + $0x38] sm:$0xff] %v355_v51 }
 0x2be   :  { %376 = vst [vmem:[#allocation5 + $0x60] sm:$0xff] %v360_v52  ;;  %377 = vst [vmem:[#allocation5 + $0x68] sm:$0xff] %v361_v14  ;;  %v339_v0 = vpop.permute.xlu1 %338 }
 0x2bf   :  { %v358_v1 = vmul.f32 %v339_v0, %v526_v5  ;;  %v359_v15 = vmul.f32 %v339_v0, %v528_v6 }
 0x2c1   :  { %374 = vst [vmem:[#allocation5 + $0x50] sm:$0xff] %v358_v1  ;;  %375 = vst [vmem:[#allocation5 + $0x58] sm:$0xff] %v359_v15 }
 0x2c2   :  { %v347_v20 = vpop.permute.xlu1 %346 }
 0x2c3   :  { %v362_v21 = vmul.f32 %v347_v20, %v552_v18  ;;  %v363_v12 = vmul.f32 %v347_v20, %v554_v19 }
 0x2c5   :  { %378 = vst [vmem:[#allocation5 + $0x70] sm:$0xff] %v362_v21  ;;  %379 = vst [vmem:[#allocation5 + $0x78] sm:$0xff] %v363_v12 }
 0x2c6   :  { %461 = shalt.err (!%p458_p9)
}
 0x2c7   :  { %391 = dma.vmem_to_hbm [thread:$0]  %s386_s3, 2048, %s620_s5, [#allocation4], %s475_s21, %s475_s21, %s476_s22  }
 0x2c8   :  { %472 = dma.done.wait [#allocation4], 2048  }
 0x2c9   :  { %473 = vsyncadd [#allocation4], 4294965248 }
 0x2ca   :  { %395 = vsyncpa [#allocation3], 1 }
 0x2cb   :  { %396 = vsyncpa [#allocation4], 1 }

</bundles_post_ra>
